<compile_context>
chip_gen: v7x
topology: tpu7x:2x2x1
jax: 0.10.0
libtpu: 0.0.40
codegen_flags: <defaults>
</compile_context>

<pallas_src>
import functools

import jax
import jax.numpy as jnp
from jax import lax
from jax.experimental import pallas as pl
from jax.experimental.pallas import tpu as pltpu

LN_EPS = 1e-5
BN_EPS = 1e-5


def _vmem_limit_bytes(estimate_bytes):
    """Generation-aware VMEM limit: never request more than 75% of capacity."""
    try:
        cap = pltpu.get_tpu_info().vmem_capacity_bytes
    except Exception:
        cap = 64 << 20          # conservative fallback = v7x per-TC VMEM
    return int(max(4 << 20, min(estimate_bytes, 0.75 * cap)))


# ---------------------------------------------------------------------------
# Kernel 1: LayerNorm (norm1), one full (T, C) batch-slice per grid step.
# ---------------------------------------------------------------------------
def _layernorm_kernel(x_ref, g_ref, b_ref, o_ref):
    x = x_ref[...].astype(jnp.float32)                      # (T, C)
    mean = jnp.mean(x, axis=-1, keepdims=True)
    xc = x - mean
    var = jnp.mean(xc * xc, axis=-1, keepdims=True)
    y = xc * lax.rsqrt(var + LN_EPS) * g_ref[...] + b_ref[...]
    o_ref[...] = y.astype(o_ref.dtype)


def _layernorm_pallas(x, gamma, beta):
    B, T, C = x.shape
    return pl.pallas_call(
        _layernorm_kernel,
        out_shape=jax.ShapeDtypeStruct((B, T, C), x.dtype),
        grid_spec=pltpu.PrefetchScalarGridSpec(
            num_scalar_prefetch=0,
            grid=(B,),
            in_specs=[
                pl.BlockSpec((None, T, C), lambda b: (b, 0, 0)),
                pl.BlockSpec((1, C), lambda b: (0, 0)),
                pl.BlockSpec((1, C), lambda b: (0, 0)),
            ],
            out_specs=pl.BlockSpec((None, T, C), lambda b: (b, 0, 0)),
        ),
        compiler_params=pltpu.CompilerParams(
            dimension_semantics=("parallel",)),
    )(x, gamma.reshape(1, C), beta.reshape(1, C))


# ---------------------------------------------------------------------------
# Kernel 2: fused per-batch  q/k/v proj + attention + out-proj + residual +
#           norm2 + MLP + residual.  Output is the final lane-dense (T, C).
# ---------------------------------------------------------------------------
def _attn_mlp_kernel(x_ref, qin_ref, kin_ref, vin_ref,
                     wq_ref, wk_ref, wv_ref,
                     wp_ref, bp_ref, g2_ref, b2_ref,
                     w1_ref, b1_ref, w2_ref, b2m_ref,
                     o_ref, *, num_heads):
    T, C = qin_ref.shape
    d = C // num_heads

    # full-C q/k/v projections (softmax scale already folded into wq)
    q = jnp.dot(qin_ref[...].astype(jnp.float32), wq_ref[...],
                preferred_element_type=jnp.float32)          # (T, C), pre-scaled
    k = jnp.dot(kin_ref[...].astype(jnp.float32), wk_ref[...],
                preferred_element_type=jnp.float32)
    v = jnp.dot(vin_ref[...].astype(jnp.float32), wv_ref[...],
                preferred_element_type=jnp.float32)

    # per-head softmax attention; heads merged in-register -> lane-dense (T, C)
    ctx_heads = []
    for hh in range(num_heads):
        qh = q[:, hh * d:(hh + 1) * d]
        kh = k[:, hh * d:(hh + 1) * d]
        vh = v[:, hh * d:(hh + 1) * d]
        s = lax.dot_general(qh, kh, (((1,), (1,)), ((), ())),
                            preferred_element_type=jnp.float32)      # (T, T)
        s = s - jnp.max(s, axis=-1, keepdims=True)
        p = jnp.exp(s)
        p = p * pl.reciprocal(jnp.sum(p, axis=-1, keepdims=True), approx=True)
        ctx_heads.append(jnp.dot(p, vh, preferred_element_type=jnp.float32))
    ctx = jnp.concatenate(ctx_heads, axis=-1)                 # (T, C) merged heads

    # attention output projection + first residual
    attn_out = jnp.dot(ctx, wp_ref[...],
                       preferred_element_type=jnp.float32) + bp_ref[...]
    y = x_ref[...].astype(jnp.float32) + attn_out

    # norm2
    mean = jnp.mean(y, axis=-1, keepdims=True)
    yc = y - mean
    var = jnp.mean(yc * yc, axis=-1, keepdims=True)
    ln = yc * lax.rsqrt(var + LN_EPS) * g2_ref[...] + b2_ref[...]

    # MLP: fc1 -> exact GELU -> fc2   (dropout p=0.0 is identity)
    h = jnp.dot(ln, w1_ref[...], preferred_element_type=jnp.float32) + b1_ref[...]
    h = jax.nn.gelu(h, approximate=False)
    mlp = jnp.dot(h, w2_ref[...], preferred_element_type=jnp.float32) + b2m_ref[...]

    o_ref[...] = (y + mlp).astype(o_ref.dtype)


def _attn_mlp_pallas(x, q_in, k_in, v_in, wq_s, wk, wv, wp, bp, g2, b2,
                     w1, b1, w2, b2m, *, num_heads):
    B, T, C = x.shape
    Hh = w1.shape[1]

    def tok_spec():
        return pl.BlockSpec((None, T, C), lambda b: (b, 0, 0))

    def const_spec(shape):
        return pl.BlockSpec(shape, lambda b: (0,) * len(shape))

    itemsize = 4
    streamed = 5 * T * C * itemsize * 2                       # x,q,k,v in + out (x2 bufs)
    resident = (4 * C * C + 2 * C * Hh + 3 * C + Hh + C) * itemsize * 2
    acts = (5 * T * C + T * Hh + T * T) * itemsize             # f32 intermediates
    vmem_limit = _vmem_limit_bytes(2 * (streamed + resident + acts) + (16 << 20))

    return pl.pallas_call(
        functools.partial(_attn_mlp_kernel, num_heads=num_heads),
        out_shape=jax.ShapeDtypeStruct((B, T, C), x.dtype),
        grid_spec=pltpu.PrefetchScalarGridSpec(
            num_scalar_prefetch=0,
            grid=(B,),
            in_specs=[
                tok_spec(),            # x (residual)
                tok_spec(),            # q_in
                tok_spec(),            # k_in
                tok_spec(),            # v_in
                const_spec((C, C)),    # wq (pre-scaled)
                const_spec((C, C)),    # wk
                const_spec((C, C)),    # wv
                const_spec((C, C)),    # proj weight
                const_spec((1, C)),    # proj bias
                const_spec((1, C)),    # norm2 gamma
                const_spec((1, C)),    # norm2 beta
                const_spec((C, Hh)),   # fc1 weight
                const_spec((1, Hh)),   # fc1 bias
                const_spec((Hh, C)),   # fc2 weight
                const_spec((1, C)),    # fc2 bias
            ],
            out_specs=pl.BlockSpec((None, T, C), lambda b: (b, 0, 0)),
        ),
        compiler_params=pltpu.CompilerParams(
            dimension_semantics=("parallel",),
            vmem_limit_bytes=vmem_limit),
    )(x, q_in, k_in, v_in, wq_s, wk, wv, wp,
      bp.reshape(1, C), g2.reshape(1, C), b2.reshape(1, C),
      w1, b1.reshape(1, Hh), w2, b2m.reshape(1, C))


# ---------------------------------------------------------------------------
# 3x3 depthwise conv + folded BatchNorm (eval mode), NHWC, exact f32 VPU MACs.
# TODO(synk): stays in XLA between the two Pallas kernels (no Pallas conv here).
# ---------------------------------------------------------------------------
def _dw_conv_bn_nhwc(x_nhwc, conv_w_oihw, bn_scale, bn_shift):
    B, Hs, Ws, C = x_nhwc.shape
    xp = jnp.pad(x_nhwc, ((0, 0), (1, 1), (1, 1), (0, 0)))
    out = jnp.zeros_like(x_nhwc)
    for dy in range(3):
        for dx in range(3):
            out = out + xp[:, dy:dy + Hs, dx:dx + Ws, :] * \
                  conv_w_oihw[:, 0, dy, dx][None, None, None, :]
    return out * bn_scale[None, None, None, :] + bn_shift[None, None, None, :]


# ---------------------------------------------------------------------------
# Full Block forward (Pallas path) and pure-JAX reference.
# ---------------------------------------------------------------------------
def block_forward_pallas(x, params, h, w, *, num_heads, with_cls_token=True):
    B, T, C = x.shape
    # NOTE: matches the PyTorch module: scale = dim_out ** -0.5 (not head_dim).
    scale = float(C) ** (-0.5)

    xn = _layernorm_pallas(x, params["g1"], params["b1"])

    if with_cls_token:
        cls_tok, spatial = xn[:, :1], xn[:, 1:]
    else:
        cls_tok, spatial = None, xn
    x_sp = spatial.reshape(B, h, w, C)                        # NHWC, no transposes

    def conv_branch(cw, s, t):
        y = _dw_conv_bn_nhwc(x_sp, cw, s, t).reshape(B, h * w, C)
        return jnp.concatenate([cls_tok, y], axis=1) if with_cls_token else y

    q_in = conv_branch(params["conv_q_w"], params["bn_q_scale"], params["bn_q_shift"])
    k_in = conv_branch(params["conv_k_w"], params["bn_k_scale"], params["bn_k_shift"])
    v_in = conv_branch(params["conv_v_w"], params["bn_v_scale"], params["bn_v_shift"])

    return _attn_mlp_pallas(
        x, q_in, k_in, v_in,
        params["wq"] * scale,              # softmax scale folded into wq
        params["wk"], params["wv"],
        params["wp"], params["bp"], params["g2"], params["b2"],
        params["w1"], params["b1_mlp"], params["w2"], params["b2_mlp"],
        num_heads=num_heads)


def block_forward_reference(x, params, h, w, *, num_heads, with_cls_token=True):
    B, T, C = x.shape
    scale = float(C) ** (-0.5)
    hp = lax.Precision.HIGHEST

    def layernorm(v, g, b):
        m = v.mean(-1, keepdims=True)
        var = ((v - m) ** 2).mean(-1, keepdims=True)
        return (v - m) / jnp.sqrt(var + LN_EPS) * g + b

    xn = layernorm(x, params["g1"], params["b1"])
    if with_cls_token:
        cls_tok, spatial = xn[:, :1], xn[:, 1:]
    else:
        cls_tok, spatial = None, xn
    x_sp = spatial.reshape(B, h, w, C)

    def dwconv(xs, cw):                     # independent 9-tap depthwise (exact f32)
        Hs, Ws = xs.shape[1], xs.shape[2]
        xp = jnp.pad(xs, ((0, 0), (1, 1), (1, 1), (0, 0)))
        out = jnp.zeros_like(xs)
        for dy in range(3):
            for dx in range(3):
                out = out + xp[:, dy:dy + Hs, dx:dx + Ws, :] * \
                      cw[:, 0, dy, dx][None, None, None, :]
        return out

    def conv_branch(cw, s, t):
        y = dwconv(x_sp, cw) * s[None, None, None, :] + t[None, None, None, :]
        y = y.reshape(B, h * w, C)
        return jnp.concatenate([cls_tok, y], 1) if with_cls_token else y

    q_in = conv_branch(params["conv_q_w"], params["bn_q_scale"], params["bn_q_shift"])
    k_in = conv_branch(params["conv_k_w"], params["bn_k_scale"], params["bn_k_shift"])
    v_in = conv_branch(params["conv_v_w"], params["bn_v_scale"], params["bn_v_shift"])

    d = C // num_heads

    def heads(z, wt):
        z = jnp.einsum("btc,cf->btf", z, wt, precision=hp)
        return z.reshape(B, T, num_heads, d).transpose(0, 2, 1, 3)

    q = heads(q_in, params["wq"])
    k = heads(k_in, params["wk"])
    v = heads(v_in, params["wv"])
    s = jnp.einsum("bhld,bhtd->bhlt", q, k, precision=hp) * scale
    a = jax.nn.softmax(s, axis=-1)
    o = jnp.einsum("bhlt,bhtd->bhld", a, v, precision=hp)
    o = o.transpose(0, 2, 1, 3).reshape(B, T, C)
    attn_out = jnp.einsum("btc,cf->btf", o, params["wp"], precision=hp) + params["bp"]

    y = x + attn_out
    yn = layernorm(y, params["g2"], params["b2"])
    hmid = jax.nn.gelu(jnp.einsum("btc,ch->bth", yn, params["w1"], precision=hp)
                       + params["b1_mlp"], approximate=False)
    mlp = jnp.einsum("bth,hc->btc", hmid, params["w2"], precision=hp) + params["b2_mlp"]
    return y + mlp


if __name__ == "__main__":
    # Small CvT-style block: batch=2, 8x8 spatial tokens + 1 cls token,
    # dim_in = dim_out = 128 (lane-dense), 4 heads, mlp hidden = 4 * 128 = 512.
    B, h, w = 2, 8, 8
    C, num_heads, mlp_ratio = 128, 4, 4.0
    with_cls_token = True
    T = h * w + (1 if with_cls_token else 0)
    Hh = int(C * mlp_ratio)

    key = jax.random.PRNGKey(0)
    keys = jax.random.split(key, 32)
    ki = iter(keys)

    def normal(shape, scl=1.0):
        return scl * jax.random.normal(next(ki), shape, jnp.float32)

    x = normal((B, T, C))

    def bn_affine():
        gamma = 1.0 + 0.1 * normal((C,))
        beta = 0.1 * normal((C,))
        mean = 0.1 * normal((C,))
        var = 1.0 + 0.1 * jnp.abs(normal((C,)))
        s = gamma / jnp.sqrt(var + BN_EPS)      # eval-mode BatchNorm folded to affine
        return s, beta - mean * s

    bn_q, bn_k, bn_v = bn_affine(), bn_affine(), bn_affine()

    params = dict(
        g1=1.0 + 0.1 * normal((C,)), b1=0.1 * normal((C,)),
        conv_q_w=normal((C, 1, 3, 3), 0.2),
        conv_k_w=normal((C, 1, 3, 3), 0.2),
        conv_v_w=normal((C, 1, 3, 3), 0.2),
        bn_q_scale=bn_q[0], bn_q_shift=bn_q[1],
        bn_k_scale=bn_k[0], bn_k_shift=bn_k[1],
        bn_v_scale=bn_v[0], bn_v_shift=bn_v[1],
        wq=normal((C, C), 0.05), wk=normal((C, C), 0.05), wv=normal((C, C), 0.05),
        wp=normal((C, C), 0.05), bp=0.05 * normal((C,)),
        g2=1.0 + 0.1 * normal((C,)), b2=0.1 * normal((C,)),
        w1=normal((C, Hh), 0.05), b1_mlp=0.05 * normal((Hh,)),
        w2=normal((Hh, C), 0.05), b2_mlp=0.05 * normal((C,)),
    )

    out = block_forward_pallas(x, params, h, w, num_heads=num_heads,
                               with_cls_token=with_cls_token)
    out = jax.block_until_ready(out)

    ref = block_forward_reference(x, params, h, w, num_heads=num_heads,
                                  with_cls_token=with_cls_token)
    assert out.shape == (B, T, C)
    err = float(jnp.max(jnp.abs(out - ref)))
    # Tolerance accounts for the EUP approximate-reciprocal softmax denominator.
    assert jnp.allclose(out, ref, atol=1e-3, rtol=1e-3), \
        f"mismatch vs. reference, max abs err = {err}"

    print("KERNEL_OK")
</pallas_src>

<mosaic_0001>
module attributes {stable_mosaic.version = 11 : i64} {
  func.func @_layernorm_kernel(%arg0: i32, %arg1: memref<1x65x128xf32, #tpu.memory_space<vmem>>, %arg2: memref<1x128xf32, #tpu.memory_space<vmem>>, %arg3: memref<1x128xf32, #tpu.memory_space<vmem>>, %arg4: memref<1x65x128xf32, #tpu.memory_space<vmem>>) attributes {dimension_semantics = [#tpu.dimension_semantics<parallel>], iteration_bounds = array<i64: 2>, scalar_prefetch = 0 : i64, scratch_operands = 0 : i64, tpu.core_type = #tpu.core_type<tc>, window_params = [{transform_indices = @transform_0, window_bounds = array<i64: 1, 65, 128>}, {pipeline_mode = #tpu.pipeline_mode<synchronous>, transform_indices = @transform_1, window_bounds = array<i64: 1, 128>}, {pipeline_mode = #tpu.pipeline_mode<synchronous>, transform_indices = @transform_2, window_bounds = array<i64: 1, 128>}, {transform_indices = @transform_3, window_bounds = array<i64: 1, 65, 128>}]} {
    %c0 = arith.constant 0 : index
    %c0_0 = arith.constant 0 : index
    %c0_1 = arith.constant 0 : index
    %0 = vector.load %arg1[%c0, %c0_0, %c0_1] : memref<1x65x128xf32, #tpu.memory_space<vmem>>, vector<1x65x128xf32>
    %1 = vector.shape_cast %0 : vector<1x65x128xf32> to vector<65x128xf32>
    %cst = arith.constant dense<0.000000e+00> : vector<65xf32>
    %2 = vector.multi_reduction <add>, %1, %cst [1] : vector<65x128xf32> to vector<65xf32>
    %3 = vector.shape_cast %2 : vector<65xf32> to vector<65x1xf32>
    %cst_2 = arith.constant 1.280000e+02 : f32
    %4 = vector.broadcast %cst_2 : f32 to vector<65x1xf32>
    %5 = arith.divf %3, %4 : vector<65x1xf32>
    %6 = vector.broadcast %5 : vector<65x1xf32> to vector<65x128xf32>
    %7 = arith.subf %1, %6 : vector<65x128xf32>
    %8 = arith.mulf %7, %7 : vector<65x128xf32>
    %cst_3 = arith.constant dense<0.000000e+00> : vector<65xf32>
    %9 = vector.multi_reduction <add>, %8, %cst_3 [1] : vector<65x128xf32> to vector<65xf32>
    %10 = vector.shape_cast %9 : vector<65xf32> to vector<65x1xf32>
    %cst_4 = arith.constant 1.280000e+02 : f32
    %11 = vector.broadcast %cst_4 : f32 to vector<65x1xf32>
    %12 = arith.divf %10, %11 : vector<65x1xf32>
    %cst_5 = arith.constant 9.99999974E-6 : f32
    %13 = vector.broadcast %cst_5 : f32 to vector<65x1xf32>
    %14 = arith.addf %12, %13 : vector<65x1xf32>
    %15 = math.rsqrt %14 : vector<65x1xf32>
    %16 = vector.broadcast %15 : vector<65x1xf32> to vector<65x128xf32>
    %17 = arith.mulf %7, %16 : vector<65x128xf32>
    %c0_6 = arith.constant 0 : index
    %c0_7 = arith.constant 0 : index
    %18 = vector.load %arg2[%c0_6, %c0_7] : memref<1x128xf32, #tpu.memory_space<vmem>>, vector<1x128xf32>
    %19 = vector.broadcast %18 : vector<1x128xf32> to vector<65x128xf32>
    %20 = arith.mulf %17, %19 : vector<65x128xf32>
    %c0_8 = arith.constant 0 : index
    %c0_9 = arith.constant 0 : index
    %21 = vector.load %arg3[%c0_8, %c0_9] : memref<1x128xf32, #tpu.memory_space<vmem>>, vector<1x128xf32>
    %22 = vector.broadcast %21 : vector<1x128xf32> to vector<65x128xf32>
    %23 = arith.addf %20, %22 : vector<65x128xf32>
    %c0_10 = arith.constant 0 : index
    %c0_11 = arith.constant 0 : index
    %c0_12 = arith.constant 0 : index
    %24 = vector.load %arg4[%c0_10, %c0_11, %c0_12] : memref<1x65x128xf32, #tpu.memory_space<vmem>>, vector<1x65x128xf32>
    %25 = vector.shape_cast %24 : vector<1x65x128xf32> to vector<65x128xf32>
    %26 = vector.shape_cast %23 : vector<65x128xf32> to vector<1x65x128xf32>
    tpu.vector_store %arg4[%c0_10, %c0_11, %c0_12], %26 {strides = array<i32>} : memref<1x65x128xf32, #tpu.memory_space<vmem>>, vector<1x65x128xf32>,
    return
  }
  func.func @transform_0(%arg0: i32) -> (i32, i32, i32) {
    %c0_i32 = arith.constant 0 : i32
    %c0_i32_0 = arith.constant 0 : i32
    %c0_i32_1 = arith.constant 0 : i32
    return %arg0, %c0_i32, %c0_i32_0 : i32, i32, i32
  }
  func.func @transform_1(%arg0: i32) -> (i32, i32) {
    %c0_i32 = arith.constant 0 : i32
    %c0_i32_0 = arith.constant 0 : i32
    %c0_i32_1 = arith.constant 0 : i32
    return %c0_i32, %c0_i32_0 : i32, i32
  }
  func.func @transform_2(%arg0: i32) -> (i32, i32) {
    %c0_i32 = arith.constant 0 : i32
    %c0_i32_0 = arith.constant 0 : i32
    %c0_i32_1 = arith.constant 0 : i32
    return %c0_i32, %c0_i32_0 : i32, i32
  }
  func.func @transform_3(%arg0: i32) -> (i32, i32, i32) {
    %c0_i32 = arith.constant 0 : i32
    %c0_i32_0 = arith.constant 0 : i32
    %c0_i32_1 = arith.constant 0 : i32
    return %arg0, %c0_i32, %c0_i32_0 : i32, i32, i32
  }
}

</mosaic_0001>

<bundles_post_ra>
// kernel: tpu_custom_call.1
= control target key start
LH: loop header
LB: loop body
LE: loop exit
PB: predicated region body
PF: predicated region fallthrough
CT: control target
= control target key end

     0   :  { %s445_s12 = smov 0   ;;  %s533_s0 = inlined_call_operand.vmem [shape: f32[2,65,128], index: 0, kind: input, shape index: {}]   ;;  %s534_s1 = inlined_call_operand.vmem [shape: f32[1,128], index: 1, kind: input, shape index: {}]   ;;  %s535_s2 = inlined_call_operand.vmem [shape: f32[1,128], index: 2, kind: input, shape index: {}]   ;;  %s536_s3 = inlined_call_operand.vmem [shape: f32[2,65,128], index: 3, kind: output, shape index: {}]  }
   0x1 LB: > { %s379_s13 = sadd.s32 4294967295, %s423_s12   ;;  %p383_p0 = scmp.ge.s32.totalorder %s423_s12, 1  ;;  %s423_s12 = sphi %s445_s12, %s13_s12  }
   0x2   : > { %p137_p1 = scmp.lt.s32.totalorder %s423_s12, 3 }
   0x4   : > { %p138_p2 = pnand %p383_p0, %p137_p1 }
   0x5   : > { %p161_p3 = scmp.lt.s32.totalorder (!%p138_p2), %s379_s13, 1  ;;  %vm196_vm0 = vcmask (!%p138_p2), 1040384  }
   0x6   : > { %141 = sbr.rel (%p138_p2) target bundleno = 347 (0x15b), region = 32 }
   0xd   : > { %s538_s13 = smov (!%p161_p3, %s379_s13), 1 }
   0xe   : > { %s390_s14 = smul.u32 72, %s538_s13 }
  0x10   : > { %s165_s17 = scalar_lea.vmem %s533_s0, %s390_s14  ;;  %s512_s24 = scalar_lea.vmem %s536_s3, %s390_s14 }
  0x11   : > { %v172_v0 = vld [vmem:[%s165_s17 + $0x8] sm:$0xff]  ;;  %v171_v1 = vld [vmem:[%s165_s17] sm:$0xff]  ;;  %v173_v2 = vld [vmem:[%s165_s17 + $0x10] sm:$0xff] }
  0x12   : > { %182 = vadd.xlane.f32.xlu1 %v172_v0  ;;  %180 = vadd.xlane.f32.xlu0 %v171_v1  ;;  %v174_v3 = vld [vmem:[%s165_s17 + $0x18] sm:$0xff]  ;;  %v179_v4 = vld [vmem:[%s165_s17 + $0x40] sm:$0x1]  ;;  %v177_v7 = vld [vmem:[%s165_s17 + $0x30] sm:$0xff] }
  0x13   : > { %v175_v5 = vld [vmem:[%s165_s17 + $0x20] sm:$0xff]  ;;  %v197_v6 = vsel %vm196_vm0, %v179_v4, 0.0  ;;  %v176_v8 = vld [vmem:[%s165_s17 + $0x28] sm:$0xff]  ;;  %v178_v9 = vld [vmem:[%s165_s17 + $0x38] sm:$0xff] }
  0x16   : > { %184 = vadd.xlane.f32.xlu1 %v173_v2  ;;  %186 = vadd.xlane.f32.xlu0 %v174_v3 }
  0x1a   : > { %188 = vadd.xlane.f32.xlu1 %v175_v5  ;;  %198 = vadd.xlane.f32.xlu0 %v197_v6 }
  0x1e   : > { %192 = vadd.xlane.f32.xlu1 %v177_v7  ;;  %190 = vadd.xlane.f32.xlu0 %v176_v8 }
  0x22   : > { %194 = vadd.xlane.f32.xlu0 %v178_v9 }
  0x9f   : > { %v183_v10 = vpop.xlane.xlu1 %182  ;;  %v181_v11 = vpop.xlane.xlu0 %180 }
  0xa0   : > { %v202_v12 = vmul.f32 0.0078125, %v183_v10  ;;  %v201_v13 = vmul.f32 0.0078125, %v181_v11  ;;  %v387_v10 = vld [vmem:[%s535_s2] ss:$0 sm:$0xff] }
  0xa2   : > { %v462_v14 = vsub.f32 %v172_v0, %v202_v12  ;;  %v464_v15 = vsub.f32 %v171_v1, %v201_v13 }
  0xa3   : > { %v185_v16 = vpop.xlane.xlu1 %184  ;;  %v187_v17 = vpop.xlane.xlu0 %186 }
  0xa4   : > { %v203_v18 = vmul.f32 0.0078125, %v185_v16  ;;  %v204_v19 = vmul.f32 0.0078125, %v187_v17  ;;  %v220_v20 = vmul.f32 %v462_v14, %v462_v14  ;;  %v219_v21 = vmul.f32 %v464_v15, %v464_v15 }
  0xa6   : > { %v470_v22 = vsub.f32 %v173_v2, %v203_v18  ;;  %v472_v23 = vsub.f32 %v174_v3, %v204_v19  ;;  %230 = vadd.xlane.f32.xlu0 %v220_v20  ;;  %228 = vadd.xlane.f32.xlu1 %v219_v21  ;;  %v386_v3 = vld [vmem:[%s534_s1] ss:$0 sm:$0xff] }
  0xa7   : > { %v189_v24 = vpop.xlane.xlu1 %188  ;;  %v199_v25 = vpop.xlane.xlu0 %198 }
  0xa8   : > { %v205_v26 = vmul.f32 0.0078125, %v189_v24  ;;  %v221_v27 = vmul.f32 %v470_v22, %v470_v22  ;;  %v222_v28 = vmul.f32 %v472_v23, %v472_v23  ;;  %v209_v29 = vmul.f32 0.0078125, %v199_v25 }
  0xaa   : > { %v478_v30 = vsub.f32 %v175_v5, %v205_v26  ;;  %232 = vadd.xlane.f32.xlu1 %v221_v27  ;;  %234 = vadd.xlane.f32.xlu0 %v222_v28  ;;  %v482_v36 = vsub.f32 %v179_v4, %v209_v29 }
  0xab   : > { %v193_v31 = vpop.xlane.xlu1 %192  ;;  %v191_v32 = vpop.xlane.xlu0 %190 }
  0xac   : > { %v207_v33 = vmul.f32 0.0078125, %v193_v31  ;;  %v206_v34 = vmul.f32 0.0078125, %v191_v32  ;;  %v223_v35 = vmul.f32 %v478_v30, %v478_v30  ;;  %v227_v43 = vmul.f32 %v482_v36, %v482_v36 }
  0xae   : > { %v484_v37 = vsub.f32 %v177_v7, %v207_v33  ;;  %v486_v38 = vsub.f32 %v176_v8, %v206_v34  ;;  %236 = vadd.xlane.f32.xlu1 %v223_v35  ;;  %v244_v46 = vsel %vm196_vm0, %v227_v43, 0.0 }
  0xaf   : > { %v195_v39 = vpop.xlane.xlu0 %194 }
  0xb0   : > { %v208_v40 = vmul.f32 0.0078125, %v195_v39  ;;  %v225_v41 = vmul.f32 %v484_v37, %v484_v37  ;;  %v224_v42 = vmul.f32 %v486_v38, %v486_v38 }
  0xb2   : > { %v494_v44 = vsub.f32 %v178_v9, %v208_v40  ;;  %240 = vadd.xlane.f32.xlu1 %v225_v41  ;;  %238 = vadd.xlane.f32.xlu0 %v224_v42 }
  0xb4   : > { %v226_v45 = vmul.f32 %v494_v44, %v494_v44 }
  0xb6   : > { %245 = vadd.xlane.f32.xlu1 %v244_v46  ;;  %242 = vadd.xlane.f32.xlu0 %v226_v45 }
 0x133   : > { %v229_v47 = vpop.xlane.xlu1 %228  ;;  %v231_v48 = vpop.xlane.xlu0 %230 }
 0x134   : > { %v247_v49 = vmul.f32 0.0078125, %v229_v47  ;;  %v248_v50 = vmul.f32 0.0078125, %v231_v48 }
 0x136   : > { %v256_v51 = vadd.f32 1e-05, %v247_v49  ;;  %v257_v52 = vadd.f32 1e-05, %v248_v50 }
 0x137   : > { %v233_v53 = vpop.xlane.xlu1 %232  ;;  %v235_v54 = vpop.xlane.xlu0 %234 }
 0x138   : > { %399 = vrsqrt.f32 %v256_v51  ;;  %v249_v55 = vmul.f32 0.0078125, %v233_v53  ;;  %v250_v56 = vmul.f32 0.0078125, %v235_v54 }
 0x139   : > { %401 = vrsqrt.f32 %v257_v52 }
 0x13a   : > { %v258_v57 = vadd.f32 1e-05, %v249_v55  ;;  %v259_v58 = vadd.f32 1e-05, %v250_v56 }
 0x13b   : > { %v237_v59 = vpop.xlane.xlu1 %236 }
 0x13c   : > { %403 = vrsqrt.f32 %v258_v57  ;;  %v251_v60 = vmul.f32 0.0078125, %v237_v59 }
 0x13d   : > { %405 = vrsqrt.f32 %v259_v58 }
 0x13e   : > { %v260_v61 = vadd.f32 1e-05, %v251_v60 }
 0x13f   : > { %v241_v62 = vpop.xlane.xlu1 %240  ;;  %v239_v63 = vpop.xlane.xlu0 %238 }
 0x140   : > { %407 = vrsqrt.f32 %v260_v61  ;;  %v253_v0 = vmul.f32 0.0078125, %v241_v62  ;;  %v252_v1 = vmul.f32 0.0078125, %v239_v63 }
 0x142   : > { %v400_v2 = vpop.eup %399  ;;  %v262_v4 = vadd.f32 1e-05, %v253_v0  ;;  %v261_v5 = vadd.f32 1e-05, %v252_v1 }
 0x143   : > { %v402_v6 = vpop.eup %401  ;;  %v274_v7 = vmul.f32 %v400_v2, %v464_v15  ;;  %v246_v8 = vpop.xlane.xlu1 %245 }
 0x144   : > { %v243_v9 = vpop.xlane.xlu0 %242  ;;  %v275_v11 = vmul.f32 %v402_v6, %v462_v14  ;;  %409 = vrsqrt.f32 %v262_v4  ;;  %v255_v12 = vmul.f32 0.0078125, %v246_v8 }
 0x145   : > { %v254_v13 = vmul.f32 0.0078125, %v243_v9  ;;  %v290_v16 = vmul.f32 %v386_v3, %v274_v7  ;;  %411 = vrsqrt.f32 %v261_v5 }
 0x146   : > { %v404_v17 = vpop.eup %403  ;;  %v291_v15 = vmul.f32 %v386_v3, %v275_v11  ;;  %v264_v18 = vadd.f32 1e-05, %v255_v12 }
 0x147   : > { %v263_v19 = vadd.f32 1e-05, %v254_v13  ;;  %v406_v20 = vpop.eup %405  ;;  %v306_v14 = vadd.f32 %v387_v10, %v290_v16  ;;  %v276_v21 = vmul.f32 %v404_v17, %v470_v22 }
 0x148   : > { %v307_v24 = vadd.f32 %v387_v10, %v291_v15  ;;  %v277_v25 = vmul.f32 %v406_v20, %v472_v23  ;;  %413 = vrsqrt.f32 %v264_v18 }
 0x149   : > { %315 = vst [vmem:[%s512_s24] sm:$0xff] %v306_v14  ;;  %v292_v26 = vmul.f32 %v386_v3, %v276_v21  ;;  %415 = vrsqrt.f32 %v263_v19 }
 0x14a   : > { %v408_v27 = vpop.eup %407  ;;  %316 = vst [vmem:[%s512_s24 + $0x8] sm:$0xff] %v307_v24  ;;  %v293_v28 = vmul.f32 %v386_v3, %v277_v25 }
 0x14b   : > { %v308_v29 = vadd.f32 %v387_v10, %v292_v26  ;;  %v278_v31 = vmul.f32 %v408_v27, %v478_v30 }
 0x14c   : > { %v309_v32 = vadd.f32 %v387_v10, %v293_v28 }
 0x14d   : > { %317 = vst [vmem:[%s512_s24 + $0x10] sm:$0xff] %v308_v29  ;;  %v294_v33 = vmul.f32 %v386_v3, %v278_v31 }
 0x14e   : > { %v410_v22 = vpop.eup %409  ;;  %318 = vst [vmem:[%s512_s24 + $0x18] sm:$0xff] %v309_v32 }
 0x14f   : > { %v412_v34 = vpop.eup %411  ;;  %v310_v23 = vadd.f32 %v387_v10, %v294_v33  ;;  %v280_v35 = vmul.f32 %v410_v22, %v484_v37 }
 0x150   : > { %v279_v39 = vmul.f32 %v412_v34, %v486_v38 }
 0x151   : > { %319 = vst [vmem:[%s512_s24 + $0x20] sm:$0xff] %v310_v23  ;;  %v296_v40 = vmul.f32 %v386_v3, %v280_v35 }
 0x152   : > { %v414_v41 = vpop.eup %413  ;;  %v295_v42 = vmul.f32 %v386_v3, %v279_v39 }
 0x153   : > { %v416_v30 = vpop.eup %415  ;;  %v312_v43 = vadd.f32 %v387_v10, %v296_v40  ;;  %v282_v45 = vmul.f32 %v414_v41, %v482_v36 }
 0x154   : > { %v311_v46 = vadd.f32 %v387_v10, %v295_v42  ;;  %v281_v47 = vmul.f32 %v416_v30, %v494_v44 }
 0x155   : > { %321 = vst [vmem:[%s512_s24 + $0x30] sm:$0xff] %v312_v43  ;;  %v298_v48 = vmul.f32 %v386_v3, %v282_v45 }
 0x156   : > { %320 = vst [vmem:[%s512_s24 + $0x28] sm:$0xff] %v311_v46  ;;  %v297_v49 = vmul.f32 %v386_v3, %v281_v47 }
 0x157   : > { %v314_v37 = vadd.f32 %v387_v10, %v298_v48 }
 0x158   : > { %v313_v50 = vadd.f32 %v387_v10, %v297_v49 }
 0x159   : > { %323 = vst [vmem:[%s512_s24 + $0x40] sm:$0x1] %v314_v37 }
 0x15a   : > { %322 = vst [vmem:[%s512_s24 + $0x38] sm:$0xff] %v313_v50 }
 0x15b PF: > { %s13_s12 = sadd.s32 1, %s423_s12  }
 0x15c   : > { %p10_p4 = scmp.ge.s32.totalorder %s13_s12, 4  }
 0x15e   :  { %12 = sbr.rel (!%p10_p4) target bundleno = 1 (0x1), region = 62 }

</bundles_post_ra>
